<compile_context>
chip_gen: v7x
topology: tpu7x:2x2x1
jax: 0.10.0
libtpu: 0.0.40
codegen_flags: <defaults>
</compile_context>

<pallas_src>
import functools

import jax
import jax.numpy as jnp
from jax.experimental import pallas as pl
from jax.experimental.pallas import tpu as pltpu


def _round_up(x, m):
    return (x + m - 1) // m * m


def relu_conv1x1_kernel(w_ref, b_ref, x_ref, o_ref):
    # w_ref: (Cout_p, K_p)  bf16   padded weights (zero rows/cols)
    # b_ref: (Cout_p, 1)    f32    padded bias (column vector, lane-broadcast)
    # x_ref: (K_p, TP)      f32    one pixel tile of the padded input
    # o_ref: (Cout_p, TP)   f32
    x = jnp.maximum(x_ref[...], 0.0).astype(jnp.bfloat16)          # ReLU (VPU) + bf16 cast
    acc = jnp.dot(w_ref[...], x, preferred_element_type=jnp.float32)  # MXU, f32 accumulate
    o_ref[...] = acc + b_ref[...]                                    # bias broadcast along lanes


def prepare_params(weight, bias, k_pad, cout_pad):
    """One-time (per model) padding + bf16 cast of the conv parameters."""
    cout, cin = weight.shape[0], weight.shape[1]
    wm = weight.reshape(cout, cin).astype(jnp.bfloat16)
    wm = jnp.pad(wm, ((0, cout_pad - cout), (0, k_pad - cin)))
    bm = jnp.pad(bias.astype(jnp.float32), (0, cout_pad - cout)).reshape(cout_pad, 1)
    return wm, bm


@functools.partial(jax.jit, static_argnames=("cout",))
def relu_conv2d_1x1(x_nchw, w_pad, b_col, *, cout):
    """Fused ReLU + 1x1 conv computed as (Cout,K) @ (K, N*H*W); NCHW in/out, no transposes."""
    N, Cin, H, W = x_nchw.shape
    Cout_p, K_p = w_pad.shape
    HW = H * W

    # Lane-dense pixel padding; pick a pixel tile that stays small in VMEM.
    P_pad = _round_up(HW, 128)
    TP = min(512, P_pad)
    P_pad = _round_up(P_pad, TP)

    # NCHW -> (N, Cin, H*W) is a contiguous reshape; zero-pad K and pixel dims.
    x3 = x_nchw.reshape(N, Cin, HW)
    x3 = jnp.pad(x3, ((0, 0), (0, K_p - Cin), (0, P_pad - HW)))

    cost = pl.CostEstimate(
        flops=2 * N * Cout_p * K_p * P_pad,
        transcendentals=0,
        bytes_accessed=(x3.size * 4 + w_pad.size * 2 + b_col.size * 4
                        + N * Cout_p * P_pad * 4),
    )

    out = pl.pallas_call(
        relu_conv1x1_kernel,
        out_shape=jax.ShapeDtypeStruct((N, Cout_p, P_pad), jnp.float32),
        grid=(N, P_pad // TP),
        in_specs=[
            pl.BlockSpec((Cout_p, K_p), lambda n, j: (0, 0)),       # weights (resident)
            pl.BlockSpec((Cout_p, 1), lambda n, j: (0, 0)),         # bias column
            pl.BlockSpec((None, K_p, TP), lambda n, j: (n, 0, j)),  # input pixel tile
        ],
        out_specs=pl.BlockSpec((None, Cout_p, TP), lambda n, j: (n, 0, j)),
        compiler_params=pltpu.CompilerParams(
            dimension_semantics=("parallel", "parallel")),
        cost_estimate=cost,
    )(w_pad, b_col, x3)

    # Drop padding, reshape straight back to NCHW (contiguous).
    return out[:, :cout, :HW].reshape(N, cout, H, W)


if __name__ == "__main__":
    key = jax.random.PRNGKey(0)
    kx, kw, kb = jax.random.split(key, 3)

    # Shapes implied by the module: ReLU + Conv2d(48, 192, kernel_size=1) on [1, 48, 13, 13]
    N, Cin, H, W, Cout = 1, 48, 13, 13, 192
    x = jax.random.normal(kx, (N, Cin, H, W), dtype=jnp.float32)

    # Deterministic parameter init (uniform, PyTorch fan-in bound style).
    bound = 1.0 / (Cin ** 0.5)
    weight = jax.random.uniform(kw, (Cout, Cin, 1, 1), jnp.float32, -bound, bound)
    bias = jax.random.uniform(kb, (Cout,), jnp.float32, -bound, bound)

    # One-time parameter prep (padding + bf16 cast) outside the per-call path.
    K_pad = _round_up(Cin, 128)
    Cout_pad = _round_up(Cout, 8)
    w_pad, b_col = prepare_params(weight, bias, K_pad, Cout_pad)

    y = relu_conv2d_1x1(x, w_pad, b_col, cout=Cout)
    y = jax.block_until_ready(y)

    # Pure-JAX f32 reference of the fused ReLU + 1x1 conv (kernel matmul runs in bf16,
    # f32 accumulate -> relaxed tolerance).
    xr = jnp.maximum(x, 0.0)
    ref = jnp.einsum("nchw,oc->nohw", xr, weight.reshape(Cout, Cin)) + bias[None, :, None, None]
    assert y.shape == (N, Cout, H, W)
    assert jnp.allclose(y, ref, atol=2e-2, rtol=2e-2), float(jnp.max(jnp.abs(y - ref)))

    print("KERNEL_OK")
</pallas_src>

<mosaic_0001>
module attributes {stable_mosaic.version = 11 : i64} {
  func.func @relu_conv1x1_kernel(%arg0: i32, %arg1: i32, %arg2: memref<192x128xbf16, #tpu.memory_space<vmem>>, %arg3: memref<192x1xf32, #tpu.memory_space<vmem>>, %arg4: memref<1x128x256xf32, #tpu.memory_space<vmem>>, %arg5: memref<1x192x256xf32, #tpu.memory_space<vmem>>) attributes {dimension_semantics = [#tpu.dimension_semantics<parallel>, #tpu.dimension_semantics<parallel>], iteration_bounds = array<i64: 1, 1>, scalar_prefetch = 0 : i64, scratch_operands = 0 : i64, tpu.core_type = #tpu.core_type<tc>, window_params = [{pipeline_mode = #tpu.pipeline_mode<synchronous>, transform_indices = @transform_0, window_bounds = array<i64: 192, 128>}, {pipeline_mode = #tpu.pipeline_mode<synchronous>, transform_indices = @transform_1, window_bounds = array<i64: 192, 1>}, {transform_indices = @transform_2, window_bounds = array<i64: 1, 128, 256>}, {transform_indices = @transform_3, window_bounds = array<i64: 1, 192, 256>}]} {
    %c0 = arith.constant 0 : index
    %c0_0 = arith.constant 0 : index
    %c0_1 = arith.constant 0 : index
    %0 = vector.load %arg4[%c0, %c0_0, %c0_1] : memref<1x128x256xf32, #tpu.memory_space<vmem>>, vector<1x128x256xf32>
    %1 = vector.shape_cast %0 : vector<1x128x256xf32> to vector<128x256xf32>
    %cst = arith.constant 0.000000e+00 : f32
    %2 = vector.broadcast %cst : f32 to vector<128x256xf32>
    %3 = arith.maximumf %1, %2 : vector<128x256xf32>
    %4 = arith.truncf %3 : vector<128x256xf32> to vector<128x256xbf16>
    %c0_2 = arith.constant 0 : index
    %c0_3 = arith.constant 0 : index
    %5 = vector.load %arg2[%c0_2, %c0_3] : memref<192x128xbf16, #tpu.memory_space<vmem>>, vector<192x128xbf16>
    %cst_4 = arith.constant dense<0.000000e+00> : vector<192x256xf32>
    %6 = tpu.matmul %5, %4, %cst_4 {dimension_numbers = #tpu.dot_dimension_numbers<[1], [0], [0], [1], [0, 0, 1, 1], [], []>} : vector<192x128xbf16>, vector<128x256xbf16>, vector<192x256xf32> -> vector<192x256xf32>
    %c0_5 = arith.constant 0 : index
    %c0_6 = arith.constant 0 : index
    %7 = vector.load %arg3[%c0_5, %c0_6] : memref<192x1xf32, #tpu.memory_space<vmem>>, vector<192x1xf32>
    %8 = vector.broadcast %7 : vector<192x1xf32> to vector<192x256xf32>
    %9 = arith.addf %6, %8 : vector<192x256xf32>
    %c0_7 = arith.constant 0 : index
    %c0_8 = arith.constant 0 : index
    %c0_9 = arith.constant 0 : index
    %10 = vector.load %arg5[%c0_7, %c0_8, %c0_9] : memref<1x192x256xf32, #tpu.memory_space<vmem>>, vector<1x192x256xf32>
    %11 = vector.shape_cast %10 : vector<1x192x256xf32> to vector<192x256xf32>
    %12 = vector.shape_cast %9 : vector<192x256xf32> to vector<1x192x256xf32>
    tpu.vector_store %arg5[%c0_7, %c0_8, %c0_9], %12 {strides = array<i32>} : memref<1x192x256xf32, #tpu.memory_space<vmem>>, vector<1x192x256xf32>,
    return
  }
  func.func @transform_0(%arg0: i32, %arg1: i32) -> (i32, i32) {
    %c0_i32 = arith.constant 0 : i32
    %c0_i32_0 = arith.constant 0 : i32
    %c0_i32_1 = arith.constant 0 : i32
    return %c0_i32, %c0_i32_0 : i32, i32
  }
  func.func @transform_1(%arg0: i32, %arg1: i32) -> (i32, i32) {
    %c0_i32 = arith.constant 0 : i32
    %c0_i32_0 = arith.constant 0 : i32
    %c0_i32_1 = arith.constant 0 : i32
    return %c0_i32, %c0_i32_0 : i32, i32
  }
  func.func @transform_2(%arg0: i32, %arg1: i32) -> (i32, i32, i32) {
    %c0_i32 = arith.constant 0 : i32
    %c0_i32_0 = arith.constant 0 : i32
    return %arg0, %c0_i32, %arg1 : i32, i32, i32
  }
  func.func @transform_3(%arg0: i32, %arg1: i32) -> (i32, i32, i32) {
    %c0_i32 = arith.constant 0 : i32
    %c0_i32_0 = arith.constant 0 : i32
    return %arg0, %c0_i32, %arg1 : i32, i32, i32
  }
}

</mosaic_0001>

<bundles_post_ra>
// kernel: relu_conv2d_1x1.1
= control target key start
LH: loop header
LB: loop body
LE: loop exit
PB: predicated region body
PF: predicated region fallthrough
CT: control target
= control target key end

     0   :  { %v583_v3 = vmov 0   ;;  %s998_s2 = inlined_call_operand.vmem [shape: f32[1,128,256], index: 2, kind: input, shape index: {}]   ;;  %s999_s0 = inlined_call_operand.vmem [shape: bf16[192,128], index: 0, kind: input, shape index: {}]   ;;  %s1000_s1 = inlined_call_operand.vmem [shape: f32[192,1], index: 1, kind: input, shape index: {}]   ;;  %s1001_s3 = inlined_call_operand.vmem [shape: f32[1,192,256], index: 3, kind: output, shape index: {}]  }
   0x1   :  { %v16_v0 = vld [vmem:[%s998_s2 + $0x8] sm:$0xff]  ;;  %v18_v1 = vld [vmem:[%s998_s2 + $0x18] sm:$0xff]  ;;  %v15_v2 = vld [vmem:[%s998_s2] sm:$0xff]  ;;  %367 = vmatprep.mubr.bf16.mxu0 %v583_v3  ;;  %427 = vmatprep.mubr.bf16.mxu1 %v583_v3 }
   0x2   :  { %v48_v4 = vmax.f32 %v16_v0, 0.0  ;;  %v50_v5 = vmax.f32 %v18_v1, 0.0  ;;  %v17_v6 = vld [vmem:[%s998_s2 + $0x10] sm:$0xff]  ;;  %v47_v7 = vmax.f32 %v15_v2, 0.0  ;;  %v20_v8 = vld [vmem:[%s998_s2 + $0x28] sm:$0xff]  ;;  %v22_v9 = vld [vmem:[%s998_s2 + $0x38] sm:$0xff]  ;;  %570 = vset.pattern.permute.xlu1 %v583_v3  ;;  %569 = vset.pattern.permute.xlu0 %v583_v3 }
   0x3   :  { %v49_v10 = vmax.f32 %v17_v6, 0.0  ;;  %v52_v11 = vmax.f32 %v20_v8, 0.0  ;;  %v54_v12 = vmax.f32 %v22_v9, 0.0  ;;  %v19_v13 = vld [vmem:[%s998_s2 + $0x20] sm:$0xff]  ;;  %v21_v14 = vld [vmem:[%s998_s2 + $0x30] sm:$0xff]  ;;  %v24_v15 = vld [vmem:[%s998_s2 + $0x48] sm:$0xff] }
   0x4   :  { %v80_v16 = vpack.c.bf16 %v50_v5, %v48_v4  ;;  %v51_v17 = vmax.f32 %v19_v13, 0.0  ;;  %v53_v18 = vmax.f32 %v21_v14, 0.0  ;;  %v26_v19 = vld [vmem:[%s998_s2 + $0x58] sm:$0xff]  ;;  %v56_v20 = vmax.f32 %v24_v15, 0.0  ;;  %v23_v21 = vld [vmem:[%s998_s2 + $0x40] sm:$0xff]  ;;  %v25_v22 = vld [vmem:[%s998_s2 + $0x50] sm:$0xff] }
   0x5   :  { %v79_v23 = vpack.c.bf16 %v49_v10, %v47_v7  ;;  %v82_v24 = vpack.c.bf16 %v54_v12, %v52_v11  ;;  %v58_v25 = vmax.f32 %v26_v19, 0.0  ;;  %v28_v26 = vld [vmem:[%s998_s2 + $0x68] sm:$0xff]  ;;  %v30_v27 = vld [vmem:[%s998_s2 + $0x78] sm:$0xff]  ;;  %v55_v29 = vmax.f32 %v23_v21, 0.0  ;;  %v27_v34 = vld [vmem:[%s998_s2 + $0x60] sm:$0xff] }
   0x6   :  { %335 = vmatprep.subr.bf16.mxu0 %v80_v16  ;;  %552 = vmatprep.subr.bf16.mxu1 %v80_v16  ;;  %v81_v28 = vpack.c.bf16 %v53_v18, %v51_v17  ;;  %v57_v30 = vmax.f32 %v25_v22, 0.0  ;;  %v60_v32 = vmax.f32 %v28_v26, 0.0  ;;  %v62_v33 = vmax.f32 %v30_v27, 0.0  ;;  %v29_v35 = vld [vmem:[%s998_s2 + $0x70] sm:$0xff]  ;;  %v32_v36 = vld [vmem:[%s998_s2 + $0x88] sm:$0xff]  ;;  %v34_v37 = vld [vmem:[%s998_s2 + $0x98] sm:$0xff] }
   0x7   :  { %336 = vmatpush1.bf16.msra.mxu0 %v79_v23  ;;  %560 = vmatpush1.bf16.msra.mxu1 %v79_v23  ;;  %v84_v31 = vpack.c.bf16 %v58_v25, %v56_v20  ;;  %v31_v38 = vld [vmem:[%s998_s2 + $0x80] sm:$0xff]  ;;  %v59_v40 = vmax.f32 %v27_v34, 0.0  ;;  %v61_v41 = vmax.f32 %v29_v35, 0.0  ;;  %v33_v42 = vld [vmem:[%s998_s2 + $0x90] sm:$0xff]  ;;  %v64_v44 = vmax.f32 %v32_v36, 0.0  ;;  %v36_v46 = vld [vmem:[%s998_s2 + $0xa8] sm:$0xff] }
   0x8   :  { %337 = vmatprep.subr.bf16.mxu0 %v82_v24  ;;  %553 = vmatprep.subr.bf16.mxu1 %v82_v24  ;;  %v83_v39 = vpack.c.bf16 %v57_v30, %v55_v29  ;;  %v86_v43 = vpack.c.bf16 %v62_v33, %v60_v32  ;;  %v66_v45 = vmax.f32 %v34_v37, 0.0  ;;  %v38_v47 = vld [vmem:[%s998_s2 + $0xb8] sm:$0xff]  ;;  %v63_v48 = vmax.f32 %v31_v38, 0.0  ;;  %v35_v49 = vld [vmem:[%s998_s2 + $0xa0] sm:$0xff]  ;;  %v37_v51 = vld [vmem:[%s998_s2 + $0xb0] sm:$0xff] }
   0x9   :  { %v65_v50 = vmax.f32 %v33_v42, 0.0  ;;  %v85_v52 = vpack.c.bf16 %v61_v41, %v59_v40  ;;  %v68_v53 = vmax.f32 %v36_v46, 0.0  ;;  %v40_v54 = vld [vmem:[%s998_s2 + $0xc8] sm:$0xff]  ;;  %v70_v56 = vmax.f32 %v38_v47, 0.0  ;;  %v42_v57 = vld [vmem:[%s998_s2 + $0xd8] sm:$0xff]  ;;  %v39_v58 = vld [vmem:[%s998_s2 + $0xc0] sm:$0xff] }
   0xa   :  { %v88_v55 = vpack.c.bf16 %v66_v45, %v64_v44  ;;  %v67_v59 = vmax.f32 %v35_v49, 0.0  ;;  %v69_v60 = vmax.f32 %v37_v51, 0.0  ;;  %v72_v62 = vmax.f32 %v40_v54, 0.0  ;;  %v41_v63 = vld [vmem:[%s998_s2 + $0xd0] sm:$0xff]  ;;  %v44_v2 = vld [vmem:[%s998_s2 + $0xe8] sm:$0xff]  ;;  %v46_v4 = vld [vmem:[%s998_s2 + $0xf8] sm:$0xff] }
   0xb   :  { %338 = vmatpush1.bf16.msra.mxu0 %v81_v28  ;;  %561 = vmatpush1.bf16.msra.mxu1 %v81_v28  ;;  %v87_v61 = vpack.c.bf16 %v65_v50, %v63_v48  ;;  %v90_v0 = vpack.c.bf16 %v70_v56, %v68_v53  ;;  %v74_v1 = vmax.f32 %v42_v57, 0.0  ;;  %v71_v5 = vmax.f32 %v39_v58, 0.0  ;;  %v43_v6 = vld [vmem:[%s998_s2 + $0xe0] sm:$0xff]  ;;  %v121_v7 = vld [vmem:[%s1000_s1 + $0x10] sm:$0xff]  ;;  %v122_v15 = vld [vmem:[%s1000_s1 + $0x18] sm:$0xff] }
   0xc   :  { %339 = vmatprep.subr.bf16.mxu0 %v84_v31  ;;  %554 = vmatprep.subr.bf16.mxu1 %v84_v31  ;;  %v119_v8 = vld [vmem:[%s1000_s1] sm:$0xff]  ;;  %v89_v9 = vpack.c.bf16 %v69_v60, %v67_v59  ;;  %v73_v10 = vmax.f32 %v41_v63, 0.0  ;;  %v45_v11 = vld [vmem:[%s998_s2 + $0xf0] sm:$0xff]  ;;  %v76_v13 = vmax.f32 %v44_v2, 0.0  ;;  %v78_v14 = vmax.f32 %v46_v4, 0.0  ;;  %v120_v16 = vld [vmem:[%s1000_s1 + $0x8] sm:$0xff] }
   0xd   :  { %v92_v12 = vpack.c.bf16 %v74_v1, %v72_v62  ;;  %155 = vperm.xlu1 %570, %v121_v7   ;;  %145 = vperm.xlu0 %569, %v119_v8   ;;  %v75_v18 = vmax.f32 %v43_v6, 0.0  ;;  %v77_v19 = vmax.f32 %v45_v11, 0.0  ;;  %v124_v21 = vld [vmem:[%s1000_s1 + $0x28] sm:$0xff]  ;;  %v123_v22 = vld [vmem:[%s1000_s1 + $0x20] sm:$0xff]  ;;  %v572_v25 = vld [vmem:[%s999_s0 + $0x30] sm:$0xff]  }
   0xe   :  { %v91_v17 = vpack.c.bf16 %v73_v10, %v71_v5  ;;  %v94_v20 = vpack.c.bf16 %v78_v14, %v76_v13  ;;  %v571_v24 = vld [vmem:[%s999_s0] sm:$0xff]   ;;  %v126_v26 = vld [vmem:[%s1000_s1 + $0x38] sm:$0xff]  ;;  %v125_v27 = vld [vmem:[%s1000_s1 + $0x30] sm:$0xff] }
   0xf   :  { %340 = vmatpush1.bf16.msra.mxu0 %v83_v39  ;;  %562 = vmatpush1.bf16.msra.mxu1 %v83_v39  ;;  %v93_v23 = vpack.c.bf16 %v77_v19, %v75_v18  ;;  %v128_v28 = vld [vmem:[%s1000_s1 + $0x48] sm:$0xff]  ;;  %v127_v29 = vld [vmem:[%s1000_s1 + $0x40] sm:$0xff]  ;;  %v574_v31 = vld [vmem:[%s999_s0 + $0x38] sm:$0xff]  }
  0x10   :  { %341 = vmatprep.subr.bf16.mxu0 %v86_v43  ;;  %555 = vmatprep.subr.bf16.mxu1 %v86_v43  ;;  %v573_v30 = vld [vmem:[%s999_s0 + $0x8] sm:$0xff]   ;;  %v130_v32 = vld [vmem:[%s1000_s1 + $0x58] sm:$0xff]  ;;  %v129_v33 = vld [vmem:[%s1000_s1 + $0x50] sm:$0xff] }
  0x11   :  { %160 = vperm.xlu1 %570, %v122_v15   ;;  %150 = vperm.xlu0 %569, %v120_v16   ;;  %v132_v34 = vld [vmem:[%s1000_s1 + $0x68] sm:$0xff]  ;;  %v131_v35 = vld [vmem:[%s1000_s1 + $0x60] sm:$0xff]  ;;  %v575_v36 = vld [vmem:[%s999_s0 + $0x10] sm:$0xff]  }
  0x12   :  { %v576_v37 = vld [vmem:[%s999_s0 + $0x40] sm:$0xff]   ;;  %v134_v38 = vld [vmem:[%s1000_s1 + $0x78] sm:$0xff]  ;;  %v133_v39 = vld [vmem:[%s1000_s1 + $0x70] sm:$0xff] }
  0x13   :  { %342 = vmatpush1.bf16.msra.mxu0 %v85_v52  ;;  %563 = vmatpush1.bf16.msra.mxu1 %v85_v52  ;;  %v136_v40 = vld [vmem:[%s1000_s1 + $0x88] sm:$0xff]  ;;  %v135_v41 = vld [vmem:[%s1000_s1 + $0x80] sm:$0xff]  ;;  %v577_v42 = vld [vmem:[%s999_s0 + $0x18] sm:$0xff]  }
  0x14   :  { %343 = vmatprep.subr.bf16.mxu0 %v88_v55  ;;  %556 = vmatprep.subr.bf16.mxu1 %v88_v55  ;;  %v578_v43 = vld [vmem:[%s999_s0 + $0x48] sm:$0xff]   ;;  %v138_v44 = vld [vmem:[%s1000_s1 + $0x98] sm:$0xff]  ;;  %v137_v45 = vld [vmem:[%s1000_s1 + $0x90] sm:$0xff] }
  0x15   :  { %170 = vperm.xlu1 %570, %v124_v21   ;;  %165 = vperm.xlu0 %569, %v123_v22   ;;  %v140_v46 = vld [vmem:[%s1000_s1 + $0xa8] sm:$0xff]  ;;  %v139_v47 = vld [vmem:[%s1000_s1 + $0xa0] sm:$0xff]  ;;  %v580_v49 = vld [vmem:[%s999_s0 + $0x50] sm:$0xff]  }
  0x16   :  { %v579_v48 = vld [vmem:[%s999_s0 + $0x20] sm:$0xff]   ;;  %v142_v50 = vld [vmem:[%s1000_s1 + $0xb8] sm:$0xff]  ;;  %v141_v51 = vld [vmem:[%s1000_s1 + $0xb0] sm:$0xff] }
  0x17   :  { %344 = vmatpush1.bf16.msra.mxu0 %v87_v61  ;;  %564 = vmatpush1.bf16.msra.mxu1 %v87_v61  ;;  %v581_v52 = vld [vmem:[%s999_s0 + $0x28] sm:$0xff]   ;;  %v582_v53 = vld [vmem:[%s999_s0 + $0x58] sm:$0xff]  }
  0x18   :  { %345 = vmatprep.subr.bf16.mxu0 %v90_v0  ;;  %557 = vmatprep.subr.bf16.mxu1 %v90_v0 }
  0x19   :  { %180 = vperm.xlu1 %570, %v126_v26   ;;  %175 = vperm.xlu0 %569, %v125_v27  }
  0x1b   :  { %346 = vmatpush1.bf16.msra.mxu0 %v89_v9  ;;  %565 = vmatpush1.bf16.msra.mxu1 %v89_v9 }
  0x1c   :  { %347 = vmatprep.subr.bf16.mxu0 %v92_v12  ;;  %558 = vmatprep.subr.bf16.mxu1 %v92_v12 }
  0x1d   :  { %190 = vperm.xlu1 %570, %v128_v28   ;;  %185 = vperm.xlu0 %569, %v127_v29  }
  0x1f   :  { %348 = vmatpush1.bf16.msra.mxu0 %v91_v17  ;;  %566 = vmatpush1.bf16.msra.mxu1 %v91_v17 }
  0x20   :  { %349 = vmatprep.subr.bf16.mxu0 %v94_v20  ;;  %559 = vmatprep.subr.bf16.mxu1 %v94_v20 }
  0x21   :  { %200 = vperm.xlu1 %570, %v130_v32   ;;  %195 = vperm.xlu0 %569, %v129_v33  }
  0x23   :  { %350 = vmatpush1.bf16.msra.mxu0 %v93_v23  ;;  %567 = vmatpush1.bf16.msra.mxu1 %v93_v23 }
  0x25   :  { %210 = vperm.xlu1 %570, %v132_v34   ;;  %205 = vperm.xlu0 %569, %v131_v35  }
  0x26   :  { %368 = vmatmul.mubr.bf16.vlgmr.msra.gmra.mrb[0].mxu0 %v571_v24  ;;  %428 = vmatmul.mubr.bf16.vlgmr.msra.gmra.mrb[0].mxu1 %v572_v25 }
  0x27   :  { %377 = vmatprep.mubr.bf16.mxu0 %v583_v3  ;;  %437 = vmatprep.mubr.bf16.mxu1 %v583_v3 }
  0x29   :  { %220 = vperm.xlu1 %570, %v134_v38   ;;  %215 = vperm.xlu0 %569, %v133_v39  }
  0x2d   :  { %230 = vperm.xlu1 %570, %v136_v40   ;;  %225 = vperm.xlu0 %569, %v135_v41  }
  0x2e   :  { %378 = vmatmul.mubr.bf16.gmra.mrb[4].mxu0 %v573_v30  ;;  %438 = vmatmul.mubr.bf16.gmra.mrb[4].mxu1 %v574_v31 }
  0x2f   :  { %387 = vmatprep.mubr.bf16.mxu0 %v583_v3  ;;  %447 = vmatprep.mubr.bf16.mxu1 %v583_v3 }
  0x31   :  { %240 = vperm.xlu1 %570, %v138_v44   ;;  %235 = vperm.xlu0 %569, %v137_v45  }
  0x35   :  { %250 = vperm.xlu1 %570, %v140_v46   ;;  %245 = vperm.xlu0 %569, %v139_v47  }
  0x36   :  { %388 = vmatmul.mubr.bf16.gmra.mrb[8].mxu0 %v575_v36  ;;  %448 = vmatmul.mubr.bf16.gmra.mrb[8].mxu1 %v576_v37 }
  0x37   :  { %397 = vmatprep.mubr.bf16.mxu0 %v583_v3  ;;  %457 = vmatprep.mubr.bf16.mxu1 %v583_v3 }
  0x39   :  { %260 = vperm.xlu1 %570, %v142_v50   ;;  %255 = vperm.xlu0 %569, %v141_v51  }
  0x3e   :  { %398 = vmatmul.mubr.bf16.gmra.mrb[12].mxu0 %v577_v42  ;;  %458 = vmatmul.mubr.bf16.gmra.mrb[12].mxu1 %v578_v43 }
  0x3f   :  { %407 = vmatprep.mubr.bf16.mxu0 %v583_v3  ;;  %467 = vmatprep.mubr.bf16.mxu1 %v583_v3 }
  0x46   :  { %408 = vmatmul.mubr.bf16.gmra.mrb[16].mxu0 %v579_v48  ;;  %468 = vmatmul.mubr.bf16.gmra.mrb[16].mxu1 %v580_v49 }
  0x47   :  { %417 = vmatprep.mubr.bf16.mxu0 %v583_v3  ;;  %477 = vmatprep.mubr.bf16.mxu1 %v583_v3 }
  0x4e   :  { %418 = vmatmul.mubr.bf16.gmra.mrb[20].mxu0 %v581_v52  ;;  %478 = vmatmul.mubr.bf16.gmra.mrb[20].mxu1 %v582_v53 }
  0x8c   :  { %v156_v54 = vpop.permute.xlu1 %155  ;;  %v146_v55 = vpop.permute.xlu0 %145 }
  0x90   :  { %v161_v56 = vpop.permute.xlu1 %160  ;;  %v151_v57 = vpop.permute.xlu0 %150 }
  0x94   :  { %v822_v58 = vpop.permute.xlu1 %170  ;;  %v824_v59 = vpop.permute.xlu0 %165 }
  0x98   :  { %v826_v60 = vpop.permute.xlu1 %180  ;;  %v828_v3 = vpop.permute.xlu0 %175 }
  0x9c   :  { %v830_v61 = vpop.permute.xlu1 %190  ;;  %v832_v62 = vpop.permute.xlu0 %185 }
  0xa0   :  { %v834_v63 = vpop.permute.xlu1 %200  ;;  %v836_v0 = vpop.permute.xlu0 %195 }
  0xa4   :  { %v211_v1 = vpop.permute.xlu1 %210  ;;  %v206_v2 = vpop.permute.xlu0 %205 }
  0xa8   :  { %v221_v20 = vpop.permute.xlu1 %220  ;;  %v216_v21 = vpop.permute.xlu0 %215 }
  0xac   :  { %v231_v38 = vpop.permute.xlu1 %230  ;;  %v226_v39 = vpop.permute.xlu0 %225 }
  0xf9   :  { %v369_v4 = vpop.f32.mrb[0].mxu0  ;;  %v429_v5 = vpop.f32.mrb[0].mxu1 }
  0xfa   :  { %v370_v6 = vadd.f32 %v369_v4, %v146_v55  ;;  %v430_v7 = vadd.f32 %v429_v5, %v206_v2  ;;  %v371_v8 = vpop.f32.mrb[1].mxu0  ;;  %v431_v9 = vpop.f32.mrb[1].mxu1 }
  0xfb   :  { %v372_v10 = vadd.f32 %v371_v8, %v146_v55  ;;  %v432_v11 = vadd.f32 %v431_v9, %v206_v2  ;;  %v373_v12 = vpop.f32.mrb[2].mxu0  ;;  %v433_v13 = vpop.f32.mrb[2].mxu1 }
  0xfc   :  { %488 = vst [vmem:[%s1001_s3] sm:$0xff] %v370_v6  ;;  %512 = vst [vmem:[%s1001_s3 + $0xc0] sm:$0xff] %v430_v7  ;;  %v374_v14 = vadd.f32 %v373_v12, %v151_v57  ;;  %v434_v15 = vadd.f32 %v433_v13, %v211_v1  ;;  %v375_v16 = vpop.f32.mrb[3].mxu0  ;;  %v435_v17 = vpop.f32.mrb[3].mxu1 }
  0xfd   :  { %489 = vst [vmem:[%s1001_s3 + $0x8] sm:$0xff] %v372_v10  ;;  %513 = vst [vmem:[%s1001_s3 + $0xc8] sm:$0xff] %v432_v11  ;;  %v376_v18 = vadd.f32 %v375_v16, %v151_v57  ;;  %v436_v19 = vadd.f32 %v435_v17, %v211_v1  ;;  %v236_v57 = vpop.permute.xlu0 %235 }
  0xfe   :  { %490 = vst [vmem:[%s1001_s3 + $0x10] sm:$0xff] %v374_v14  ;;  %514 = vst [vmem:[%s1001_s3 + $0xd0] sm:$0xff] %v434_v15 }
  0xff   :  { %491 = vst [vmem:[%s1001_s3 + $0x18] sm:$0xff] %v376_v18  ;;  %515 = vst [vmem:[%s1001_s3 + $0xd8] sm:$0xff] %v436_v19 }
 0x101   :  { %v379_v22 = vpop.f32.mrb[4].mxu0  ;;  %v439_v23 = vpop.f32.mrb[4].mxu1 }
 0x102   :  { %v380_v24 = vadd.f32 %v379_v22, %v156_v54  ;;  %v440_v25 = vadd.f32 %v439_v23, %v216_v21  ;;  %v381_v26 = vpop.f32.mrb[5].mxu0  ;;  %v441_v27 = vpop.f32.mrb[5].mxu1 }
 0x103   :  { %v382_v28 = vadd.f32 %v381_v26, %v156_v54  ;;  %v442_v29 = vadd.f32 %v441_v27, %v216_v21  ;;  %v383_v30 = vpop.f32.mrb[6].mxu0  ;;  %v443_v31 = vpop.f32.mrb[6].mxu1 }
 0x104   :  { %492 = vst [vmem:[%s1001_s3 + $0x20] sm:$0xff] %v380_v24  ;;  %516 = vst [vmem:[%s1001_s3 + $0xe0] sm:$0xff] %v440_v25  ;;  %v384_v32 = vadd.f32 %v383_v30, %v161_v56  ;;  %v444_v33 = vadd.f32 %v443_v31, %v221_v20  ;;  %v385_v34 = vpop.f32.mrb[7].mxu0  ;;  %v445_v35 = vpop.f32.mrb[7].mxu1 }
 0x105   :  { %493 = vst [vmem:[%s1001_s3 + $0x28] sm:$0xff] %v382_v28  ;;  %517 = vst [vmem:[%s1001_s3 + $0xe8] sm:$0xff] %v442_v29  ;;  %v386_v36 = vadd.f32 %v385_v34, %v161_v56  ;;  %v446_v37 = vadd.f32 %v445_v35, %v221_v20  ;;  %v241_v56 = vpop.permute.xlu1 %240  ;;  %v246_v16 = vpop.permute.xlu0 %245 }
 0x106   :  { %494 = vst [vmem:[%s1001_s3 + $0x30] sm:$0xff] %v384_v32  ;;  %518 = vst [vmem:[%s1001_s3 + $0xf0] sm:$0xff] %v444_v33 }
 0x107   :  { %495 = vst [vmem:[%s1001_s3 + $0x38] sm:$0xff] %v386_v36  ;;  %519 = vst [vmem:[%s1001_s3 + $0xf8] sm:$0xff] %v446_v37 }
 0x109   :  { %v389_v40 = vpop.f32.mrb[8].mxu0  ;;  %v449_v41 = vpop.f32.mrb[8].mxu1 }
 0x10a   :  { %v390_v42 = vadd.f32 %v389_v40, %v824_v59  ;;  %v450_v43 = vadd.f32 %v449_v41, %v226_v39  ;;  %v391_v44 = vpop.f32.mrb[9].mxu0  ;;  %v451_v45 = vpop.f32.mrb[9].mxu1 }
 0x10b   :  { %v392_v46 = vadd.f32 %v391_v44, %v824_v59  ;;  %v452_v47 = vadd.f32 %v451_v45, %v226_v39  ;;  %v393_v48 = vpop.f32.mrb[10].mxu0  ;;  %v453_v49 = vpop.f32.mrb[10].mxu1 }
 0x10c   :  { %496 = vst [vmem:[%s1001_s3 + $0x40] sm:$0xff] %v390_v42  ;;  %520 = vst [vmem:[%s1001_s3 + $0x100] sm:$0xff] %v450_v43  ;;  %v394_v50 = vadd.f32 %v393_v48, %v822_v58  ;;  %v454_v51 = vadd.f32 %v453_v49, %v231_v38  ;;  %v395_v52 = vpop.f32.mrb[11].mxu0  ;;  %v455_v53 = vpop.f32.mrb[11].mxu1 }
 0x10d   :  { %497 = vst [vmem:[%s1001_s3 + $0x48] sm:$0xff] %v392_v46  ;;  %521 = vst [vmem:[%s1001_s3 + $0x108] sm:$0xff] %v452_v47  ;;  %v396_v54 = vadd.f32 %v395_v52, %v822_v58  ;;  %v456_v55 = vadd.f32 %v455_v53, %v231_v38  ;;  %v251_v15 = vpop.permute.xlu1 %250  ;;  %v256_v32 = vpop.permute.xlu0 %255 }
 0x10e   :  { %498 = vst [vmem:[%s1001_s3 + $0x50] sm:$0xff] %v394_v50  ;;  %522 = vst [vmem:[%s1001_s3 + $0x110] sm:$0xff] %v454_v51 }
 0x10f   :  { %499 = vst [vmem:[%s1001_s3 + $0x58] sm:$0xff] %v396_v54  ;;  %523 = vst [vmem:[%s1001_s3 + $0x118] sm:$0xff] %v456_v55 }
 0x111   :  { %v399_v58 = vpop.f32.mrb[12].mxu0  ;;  %v459_v59 = vpop.f32.mrb[12].mxu1 }
 0x112   :  { %v400_v1 = vadd.f32 %v399_v58, %v828_v3  ;;  %v460_v2 = vadd.f32 %v459_v59, %v236_v57  ;;  %v401_v4 = vpop.f32.mrb[13].mxu0  ;;  %v461_v5 = vpop.f32.mrb[13].mxu1 }
 0x113   :  { %v402_v6 = vadd.f32 %v401_v4, %v828_v3  ;;  %v462_v7 = vadd.f32 %v461_v5, %v236_v57  ;;  %v403_v8 = vpop.f32.mrb[14].mxu0  ;;  %v463_v9 = vpop.f32.mrb[14].mxu1 }
 0x114   :  { %500 = vst [vmem:[%s1001_s3 + $0x60] sm:$0xff] %v400_v1  ;;  %524 = vst [vmem:[%s1001_s3 + $0x120] sm:$0xff] %v460_v2  ;;  %v404_v10 = vadd.f32 %v403_v8, %v826_v60  ;;  %v464_v11 = vadd.f32 %v463_v9, %v241_v56  ;;  %v405_v12 = vpop.f32.mrb[15].mxu0  ;;  %v465_v13 = vpop.f32.mrb[15].mxu1 }
 0x115   :  { %501 = vst [vmem:[%s1001_s3 + $0x68] sm:$0xff] %v402_v6  ;;  %525 = vst [vmem:[%s1001_s3 + $0x128] sm:$0xff] %v462_v7  ;;  %v406_v3 = vadd.f32 %v405_v12, %v826_v60  ;;  %v466_v14 = vadd.f32 %v465_v13, %v241_v56  ;;  %v261_v31 = vpop.permute.xlu1 %260 }
 0x116   :  { %502 = vst [vmem:[%s1001_s3 + $0x70] sm:$0xff] %v404_v10  ;;  %526 = vst [vmem:[%s1001_s3 + $0x130] sm:$0xff] %v464_v11 }
 0x117   :  { %503 = vst [vmem:[%s1001_s3 + $0x78] sm:$0xff] %v406_v3  ;;  %527 = vst [vmem:[%s1001_s3 + $0x138] sm:$0xff] %v466_v14 }
 0x119   :  { %v409_v60 = vpop.f32.mrb[16].mxu0  ;;  %v469_v17 = vpop.f32.mrb[16].mxu1 }
 0x11a   :  { %v410_v18 = vadd.f32 %v409_v60, %v832_v62  ;;  %v470_v19 = vadd.f32 %v469_v17, %v246_v16  ;;  %v411_v20 = vpop.f32.mrb[17].mxu0  ;;  %v471_v21 = vpop.f32.mrb[17].mxu1 }
 0x11b   :  { %v412_v22 = vadd.f32 %v411_v20, %v832_v62  ;;  %v472_v23 = vadd.f32 %v471_v21, %v246_v16  ;;  %v413_v24 = vpop.f32.mrb[18].mxu0  ;;  %v473_v25 = vpop.f32.mrb[18].mxu1 }
 0x11c   :  { %504 = vst [vmem:[%s1001_s3 + $0x80] sm:$0xff] %v410_v18  ;;  %528 = vst [vmem:[%s1001_s3 + $0x140] sm:$0xff] %v470_v19  ;;  %v414_v26 = vadd.f32 %v413_v24, %v830_v61  ;;  %v474_v27 = vadd.f32 %v473_v25, %v251_v15  ;;  %v415_v28 = vpop.f32.mrb[19].mxu0  ;;  %v475_v29 = vpop.f32.mrb[19].mxu1 }
 0x11d   :  { %505 = vst [vmem:[%s1001_s3 + $0x88] sm:$0xff] %v412_v22  ;;  %529 = vst [vmem:[%s1001_s3 + $0x148] sm:$0xff] %v472_v23  ;;  %v416_v62 = vadd.f32 %v415_v28, %v830_v61  ;;  %v476_v30 = vadd.f32 %v475_v29, %v251_v15 }
 0x11e   :  { %506 = vst [vmem:[%s1001_s3 + $0x90] sm:$0xff] %v414_v26  ;;  %530 = vst [vmem:[%s1001_s3 + $0x150] sm:$0xff] %v474_v27 }
 0x11f   :  { %507 = vst [vmem:[%s1001_s3 + $0x98] sm:$0xff] %v416_v62  ;;  %531 = vst [vmem:[%s1001_s3 + $0x158] sm:$0xff] %v476_v30 }
 0x121   :  { %v419_v61 = vpop.f32.mrb[20].mxu0  ;;  %v479_v33 = vpop.f32.mrb[20].mxu1 }
 0x122   :  { %v420_v34 = vadd.f32 %v419_v61, %v836_v0  ;;  %v480_v35 = vadd.f32 %v479_v33, %v256_v32  ;;  %v421_v36 = vpop.f32.mrb[21].mxu0  ;;  %v481_v37 = vpop.f32.mrb[21].mxu1 }
 0x123   :  { %v422_v38 = vadd.f32 %v421_v36, %v836_v0  ;;  %v482_v39 = vadd.f32 %v481_v37, %v256_v32  ;;  %v423_v40 = vpop.f32.mrb[22].mxu0  ;;  %v483_v41 = vpop.f32.mrb[22].mxu1 }
 0x124   :  { %508 = vst [vmem:[%s1001_s3 + $0xa0] sm:$0xff] %v420_v34  ;;  %532 = vst [vmem:[%s1001_s3 + $0x160] sm:$0xff] %v480_v35  ;;  %v424_v42 = vadd.f32 %v423_v40, %v834_v63  ;;  %v484_v43 = vadd.f32 %v483_v41, %v261_v31  ;;  %v425_v44 = vpop.f32.mrb[23].mxu0  ;;  %v485_v45 = vpop.f32.mrb[23].mxu1 }
 0x125   :  { %509 = vst [vmem:[%s1001_s3 + $0xa8] sm:$0xff] %v422_v38  ;;  %533 = vst [vmem:[%s1001_s3 + $0x168] sm:$0xff] %v482_v39  ;;  %v426_v0 = vadd.f32 %v425_v44, %v834_v63  ;;  %v486_v46 = vadd.f32 %v485_v45, %v261_v31 }
 0x126   :  { %510 = vst [vmem:[%s1001_s3 + $0xb0] sm:$0xff] %v424_v42  ;;  %534 = vst [vmem:[%s1001_s3 + $0x170] sm:$0xff] %v484_v43 }
 0x127   :  { %511 = vst [vmem:[%s1001_s3 + $0xb8] sm:$0xff] %v426_v0  ;;  %535 = vst [vmem:[%s1001_s3 + $0x178] sm:$0xff] %v486_v46 }

</bundles_post_ra>
